<compile_context>
chip_gen: v6e
topology: v6e:2x2x1
jax: 0.10.0
libtpu: 0.0.40
codegen_flags: <defaults>
</compile_context>

<pallas_src>
import functools

import jax
import jax.numpy as jnp
from jax.experimental import pallas as pl
from jax.experimental.pallas import tpu as pltpu


def _ls_nll_kernel(tgt_ref, lp_ref, loss_ref, nll_ref,
                   acc_nll, acc_smooth, *,
                   epsilon, padding_idx, vocab_size, tv, sub_rows,
                   vocab_split, vtiles_per_split, mask_tail):
    s = pl.program_id(0)          # core split (parallel)
    i = pl.program_id(1)          # row tile within split (arbitrary)
    j = pl.program_id(2)          # vocab tile within split (arbitrary, innermost)

    tile_rows = acc_nll.shape[0]
    n_sub = tile_rows // sub_rows
    n_chunks = tv // 128

    @pl.when(jnp.logical_and(i == 0, j == 0))
    def _():
        acc_nll[...] = jnp.zeros_like(acc_nll)
        acc_smooth[...] = jnp.zeros_like(acc_smooth)

    col_tile = s * vtiles_per_split + j if vocab_split else j
    col_base = col_tile * tv

    # Lane index, hoisted out of all loops (JAX doesn't CSE broadcast_in_dim).
    lane = jax.lax.broadcasted_iota(jnp.int32, (sub_rows, 128), 1)

    def sub_block(r0):
        # Target ids / padding mask for this 8/16-row sub-block.
        tgt = tgt_ref[pl.ds(r0, sub_rows), :]                 # (sub_rows, 1) i32
        pad = tgt == padding_idx                              # (sub_rows, 1) bool
        sm = jnp.zeros((sub_rows, 128), jnp.float32)          # 1-2 vregs
        nl = jnp.zeros((sub_rows, 128), jnp.float32)          # 1-2 vregs
        for k in range(n_chunks):
            # Direct ref chunk load (static lane slice => free view, 1 vld per
            # vreg); f32 cast happens only here.
            chunk = lp_ref[pl.ds(r0, sub_rows),
                           pl.ds(k * 128, 128)].astype(jnp.float32)
            # Fold the column offset into the target (a (rows,1) op) instead of
            # building a per-chunk global-column iota.
            tgt_k = tgt - (col_base + k * 128)                # (sub_rows, 1)
            nl = nl + jnp.where(lane == tgt_k, chunk, 0.0)
            if mask_tail:
                valid = lane < (vocab_size - col_base - k * 128)
                sm = sm + jnp.where(valid, chunk, 0.0)
            else:
                sm = sm + chunk
        zero = jnp.zeros_like(sm)
        acc_smooth[pl.ds(r0, sub_rows), :] = (
            acc_smooth[pl.ds(r0, sub_rows), :] + jnp.where(pad, zero, sm))
        acc_nll[pl.ds(r0, sub_rows), :] = (
            acc_nll[pl.ds(r0, sub_rows), :] + jnp.where(pad, zero, nl))

    if n_sub * n_chunks <= 64:
        # Small tiles: fully unroll (LLO scheduler visibility, bounded code).
        for r in range(n_sub):
            sub_block(r * sub_rows)
    else:
        # Large tiles: real loop over sub-blocks keeps code size bounded while
        # the per-sub-block chunk loop stays unrolled.
        @pl.loop(0, n_sub)
        def _(r):
            sub_block(pl.multiple_of(r * sub_rows, sub_rows))

    @pl.when(jnp.logical_and(i == pl.num_programs(1) - 1,
                             j == pl.num_programs(2) - 1))
    def _():
        # Single cross-lane/sublane reduction in the epilogue.
        nll_sum = -jnp.sum(acc_nll[...])
        smooth_sum = -jnp.sum(acc_smooth[...])
        # Matches the reference module exactly: eps_i = eps / V,
        # loss = (1 - eps) * nll + eps_i * smooth.
        eps_i = epsilon / vocab_size
        loss = (1.0 - epsilon) * nll_sum + eps_i * smooth_sum
        nll_ref[...] = jnp.full(nll_ref.shape, nll_sum, nll_ref.dtype)
        loss_ref[...] = jnp.full(loss_ref.shape, loss, loss_ref.dtype)


def _vmem_budgets():
    """(lprobs double-buffer budget, vmem_limit cap) per TPU generation."""
    try:
        cap = int(pltpu.get_tpu_info().vmem_capacity_bytes)
    except Exception:
        cap = 64 << 20              # conservative (v7x-class) if the query fails
    if cap <= (64 << 20):           # v7x: 64 MiB VMEM per TensorCore
        return 16 << 20, 44 << 20   # ~8 MiB per lprobs buffer, 44 MiB scoped cap
    return 48 << 20, 96 << 20       # v5e / v6e: 128 MiB VMEM


def _choose_vocab_tile(V):
    """Largest lane-dense vocab tile; prefer a divisor of V (no tail mask)."""
    cap = min(V, 8192)
    best_div = None
    c = (cap // 128) * 128
    while c >= 128:
        if V % c == 0:
            best_div = c
            break
        c -= 128
    if best_div is not None and (best_div >= 2048 or best_div == V):
        return best_div
    # No useful divisor: take a large non-dividing tile; kernel masks the tail.
    return (cap // 128) * 128


def _choose_row_tile(N, tv, itemsize, budget, sub_rows):
    """Largest row tile fitting the double-buffer budget, preferring an even
    number of row tiles so the 2-way TensorCore split always engages."""
    max_rows = budget // (2 * tv * itemsize)
    max_rows = min(max(int(max_rows), sub_rows), 2048, N)
    max_rows = (max_rows // sub_rows) * sub_rows
    best_any = None
    r = max_rows
    while r >= sub_rows:
        if N % r == 0:
            if best_any is None:
                best_any = r
            if (N // r) % 2 == 0:
                return r
        r -= sub_rows
    return best_any if best_any is not None else sub_rows


def label_smoothed_cross_entropy(lprobs, target, *, epsilon, padding_idx=1,
                                 tile_rows=None, tv=None,
                                 lprobs_budget_bytes=None):
    """Returns (loss, nll_loss) scalars, matching the PyTorch module with
    reduce=True. lprobs may be f32 or bf16 (streamed in its native dtype)."""
    # TODO(synk): reduce=False (per-position losses) not implemented; the module
    # default (reduce=True) is what's reproduced here.
    # TODO(synk): ragged N (not a multiple of 8) would need padding rows with
    # target == padding_idx.
    N, V = lprobs.shape
    assert N % 8 == 0, "row count must be a multiple of 8"
    assert V % 128 == 0, "vocab size must be a multiple of 128"
    target = target.reshape(N, 1).astype(jnp.int32)

    itemsize = jnp.dtype(lprobs.dtype).itemsize
    budget, vmem_cap = _vmem_budgets()
    if lprobs_budget_bytes is not None:
        budget = int(lprobs_budget_bytes)

    tv = _choose_vocab_tile(V) if tv is None else int(tv)
    assert tv % 128 == 0
    mask_tail = (V % tv) != 0

    # bf16 streams in packed (16,128) sublanes; match the sub-block height.
    sub_rows = 16 if (itemsize < 4 and N % 16 == 0
                      and (tile_rows is None or int(tile_rows) % 16 == 0)) else 8
    if tile_rows is None:
        tile_rows = _choose_row_tile(N, tv, itemsize, budget, sub_rows)
    tile_rows = int(tile_rows)
    assert tile_rows % sub_rows == 0 and N % tile_rows == 0

    row_tiles = N // tile_rows
    v_tiles = pl.cdiv(V, tv)

    # Keep both TensorCores busy on v7x: split the row tiles when possible,
    # otherwise split the vocab tiles (both partial sums are linear and are
    # summed in the wrapper). Harmless (sequential) on 1-TC parts.
    if row_tiles % 2 == 0:
        num_splits, vocab_split = 2, False
        rps, vps = row_tiles // 2, v_tiles
    elif v_tiles % 2 == 0:
        num_splits, vocab_split = 2, True
        rps, vps = row_tiles, v_tiles // 2
    else:
        num_splits, vocab_split = 1, False
        rps, vps = row_tiles, v_tiles
    grid = (num_splits, rps, vps)

    if vocab_split:
        lp_map = lambda s, i, j: (i, s * vps + j)
        tgt_map = lambda s, i, j: (i, 0)
    else:
        lp_map = lambda s, i, j: (s * rps + i, j)
        tgt_map = lambda s, i, j: (s * rps + i, 0)

    # Scoped-VMEM request: double-buffered lprobs tile + tiled target +
    # accumulators + outputs, plus headroom, clamped to the generation cap.
    lprobs_bytes = 2 * tile_rows * tv * itemsize
    target_bytes = 2 * tile_rows * 128 * 4     # lane-padded int32 tile, 2 bufs
    acc_bytes = 2 * tile_rows * 128 * 4
    out_bytes = 2 * 2 * 8 * 128 * 4
    need = lprobs_bytes + target_bytes + acc_bytes + out_bytes + (4 << 20)
    vmem_limit = int(min(vmem_cap, max(32 << 20, need)))

    kernel = functools.partial(
        _ls_nll_kernel,
        epsilon=float(epsilon),
        padding_idx=int(padding_idx),
        vocab_size=V,
        tv=tv,
        sub_rows=sub_rows,
        vocab_split=vocab_split,
        vtiles_per_split=vps,
        mask_tail=mask_tail,
    )

    loss_p, nll_p = pl.pallas_call(
        kernel,
        out_shape=(
            jax.ShapeDtypeStruct((num_splits, 8, 128), jnp.float32),
            jax.ShapeDtypeStruct((num_splits, 8, 128), jnp.float32),
        ),
        grid_spec=pltpu.PrefetchScalarGridSpec(
            num_scalar_prefetch=0,
            grid=grid,
            in_specs=[
                # target: small tile per row tile (re-DMA'd only when i changes
                # since the vocab axis is innermost).
                pl.BlockSpec((tile_rows, 1), tgt_map),
                # lprobs: (tile_rows, tv) tiles, vocab axis innermost.
                pl.BlockSpec((tile_rows, tv), lp_map),
            ],
            out_specs=[
                pl.BlockSpec((1, 8, 128), lambda s, i, j: (s, 0, 0)),  # loss
                pl.BlockSpec((1, 8, 128), lambda s, i, j: (s, 0, 0)),  # nll
            ],
            scratch_shapes=[
                pltpu.VMEM((tile_rows, 128), jnp.float32),  # nll lane-partials
                pltpu.VMEM((tile_rows, 128), jnp.float32),  # smooth lane-partials
            ],
        ),
        compiler_params=pltpu.CompilerParams(
            dimension_semantics=("parallel", "arbitrary", "arbitrary"),
            vmem_limit_bytes=vmem_limit,
        ),
    )(target, lprobs)

    # Sum per-core-split partials (the loss is linear in the per-split sums).
    loss = jnp.sum(loss_p[:, 0, 0])
    nll = jnp.sum(nll_p[:, 0, 0])
    return loss, nll


def _reference(lprobs, target, epsilon, padding_idx):
    # pure-JAX reference of label_smoothed_nll_loss (reduce=True)
    lprobs = lprobs.astype(jnp.float32)
    target = target.reshape(-1, 1)
    nll = -jnp.take_along_axis(lprobs, target, axis=-1)
    smooth = -jnp.sum(lprobs, axis=-1, keepdims=True)
    mask = target == padding_idx
    nll = jnp.where(mask, 0.0, nll)
    smooth = jnp.where(mask, 0.0, smooth)
    nll_sum = jnp.sum(nll)
    smooth_sum = jnp.sum(smooth)
    eps_i = epsilon / lprobs.shape[-1]
    return (1.0 - epsilon) * nll_sum + eps_i * smooth_sum, nll_sum


if __name__ == "__main__":
    key = jax.random.PRNGKey(0)
    batch_size, tgt_len, vocab_size = 2, 16, 256
    N = batch_size * tgt_len
    label_smoothing = 0.1
    padding_idx = 1

    k_logits, k_tgt = jax.random.split(key)
    logits = jax.random.normal(k_logits, (N, vocab_size), dtype=jnp.float32)
    lprobs = jax.nn.log_softmax(logits, axis=-1)
    target = jax.random.randint(k_tgt, (N, 1), 0, vocab_size, dtype=jnp.int32)
    # force a couple of padding positions to exercise the ignore_index mask
    target = target.at[3, 0].set(padding_idx).at[10, 0].set(padding_idx)

    ref_loss, ref_nll = _reference(lprobs, target, label_smoothing, padding_idx)

    # 1) auto-tiled f32 path (even row-tile count -> 2-way core split)
    loss, nll_loss = label_smoothed_cross_entropy(
        lprobs, target, epsilon=label_smoothing, padding_idx=padding_idx)
    jax.block_until_ready((loss, nll_loss))
    assert jnp.allclose(loss, ref_loss, rtol=1e-5, atol=1e-5), (loss, ref_loss)
    assert jnp.allclose(nll_loss, ref_nll, rtol=1e-5, atol=1e-5), (nll_loss, ref_nll)

    # 2) forced small tiles: row tiling, vocab tiling and the row split, grid (2,2,2)
    loss2, nll2 = label_smoothed_cross_entropy(
        lprobs, target, epsilon=label_smoothing, padding_idx=padding_idx,
        tile_rows=8, tv=128)
    jax.block_until_ready((loss2, nll2))
    assert jnp.allclose(loss2, ref_loss, rtol=1e-5, atol=1e-5), (loss2, ref_loss)
    assert jnp.allclose(nll2, ref_nll, rtol=1e-5, atol=1e-5), (nll2, ref_nll)

    # 3) bf16 streaming path (16-row sub-blocks; cast to f32 inside the kernel)
    lp_bf16 = lprobs.astype(jnp.bfloat16)
    loss3, nll3 = label_smoothed_cross_entropy(
        lp_bf16, target, epsilon=label_smoothing, padding_idx=padding_idx)
    jax.block_until_ready((loss3, nll3))
    ref_loss3, ref_nll3 = _reference(lp_bf16, target, label_smoothing, padding_idx)
    assert jnp.allclose(loss3, ref_loss3, rtol=1e-4, atol=1e-3), (loss3, ref_loss3)
    assert jnp.allclose(nll3, ref_nll3, rtol=1e-4, atol=1e-3), (nll3, ref_nll3)

    # 4) vocab tail masking: tv does not divide V (V=384, tv=256)
    vocab2 = 384
    logits2 = jax.random.normal(jax.random.PRNGKey(1), (N, vocab2), jnp.float32)
    lprobs2 = jax.nn.log_softmax(logits2, axis=-1)
    target2 = jax.random.randint(jax.random.PRNGKey(2), (N, 1), 0, vocab2,
                                 dtype=jnp.int32)
    target2 = target2.at[5, 0].set(padding_idx)
    ref_loss4, ref_nll4 = _reference(lprobs2, target2, label_smoothing, padding_idx)
    loss4, nll4 = label_smoothed_cross_entropy(
        lprobs2, target2, epsilon=label_smoothing, padding_idx=padding_idx,
        tile_rows=16, tv=256)
    jax.block_until_ready((loss4, nll4))
    assert jnp.allclose(loss4, ref_loss4, rtol=1e-5, atol=1e-5), (loss4, ref_loss4)
    assert jnp.allclose(nll4, ref_nll4, rtol=1e-5, atol=1e-5), (nll4, ref_nll4)

    # 5) vocab-axis core split (odd row-tile count): N=8 rows, 2 vocab tiles
    lprobs5, target5 = lprobs[:8], target[:8]
    ref_loss5, ref_nll5 = _reference(lprobs5, target5, label_smoothing, padding_idx)
    loss5, nll5 = label_smoothed_cross_entropy(
        lprobs5, target5, epsilon=label_smoothing, padding_idx=padding_idx,
        tile_rows=8, tv=128)
    jax.block_until_ready((loss5, nll5))
    assert jnp.allclose(loss5, ref_loss5, rtol=1e-5, atol=1e-5), (loss5, ref_loss5)
    assert jnp.allclose(nll5, ref_nll5, rtol=1e-5, atol=1e-5), (nll5, ref_nll5)

    # 6) larger shape exercising the pl.loop sub-block path (still small: 1 MiB)
    N6, V6 = 512, 512
    logits6 = jax.random.normal(jax.random.PRNGKey(3), (N6, V6), jnp.float32)
    lprobs6 = jax.nn.log_softmax(logits6, axis=-1)
    target6 = jax.random.randint(jax.random.PRNGKey(4), (N6, 1), 0, V6,
                                 dtype=jnp.int32)
    target6 = target6.at[0, 0].set(padding_idx)
    ref_loss6, ref_nll6 = _reference(lprobs6, target6, label_smoothing, padding_idx)
    loss6, nll6 = label_smoothed_cross_entropy(
        lprobs6, target6, epsilon=label_smoothing, padding_idx=padding_idx)
    jax.block_until_ready((loss6, nll6))
    assert jnp.allclose(loss6, ref_loss6, rtol=1e-4, atol=1e-3), (loss6, ref_loss6)
    assert jnp.allclose(nll6, ref_nll6, rtol=1e-4, atol=1e-3), (nll6, ref_nll6)

    print("KERNEL_OK")
</pallas_src>

<mosaic_0001>
module attributes {stable_mosaic.version = 11 : i64} {
  func.func @_ls_nll_kernel(%arg0: i32, %arg1: i32, %arg2: i32, %arg3: memref<16x1xi32, #tpu.memory_space<vmem>>, %arg4: memref<16x256xf32, #tpu.memory_space<vmem>>, %arg5: memref<1x8x128xf32, #tpu.memory_space<vmem>>, %arg6: memref<1x8x128xf32, #tpu.memory_space<vmem>>, %arg7: memref<16x128xf32, #tpu.memory_space<vmem>>, %arg8: memref<16x128xf32, #tpu.memory_space<vmem>>) attributes {dimension_semantics = [#tpu.dimension_semantics<parallel>, #tpu.dimension_semantics<arbitrary>, #tpu.dimension_semantics<arbitrary>], iteration_bounds = array<i64: 2, 1, 1>, scalar_prefetch = 0 : i64, scratch_operands = 2 : i64, tpu.core_type = #tpu.core_type<tc>, window_params = [{transform_indices = @transform_0, window_bounds = array<i64: 16, 1>}, {transform_indices = @transform_1, window_bounds = array<i64: 16, 256>}, {transform_indices = @transform_2, window_bounds = array<i64: 1, 8, 128>}, {transform_indices = @transform_3, window_bounds = array<i64: 1, 8, 128>}]} {
    %c0_i32 = arith.constant 0 : i32
    %0 = arith.cmpi eq, %arg1, %c0_i32 : i32
    %c0_i32_0 = arith.constant 0 : i32
    %1 = arith.cmpi eq, %arg2, %c0_i32_0 : i32
    %2 = arith.andi %0, %1 : i1
    %3 = arith.extui %2 : i1 to i32
    %c0_i32_1 = arith.constant 0 : i32
    %4 = arith.cmpi ne, %3, %c0_i32_1 : i32
    scf.if %4 {
      %cst_43 = arith.constant 0.000000e+00 : f32
      %88 = vector.broadcast %cst_43 : f32 to vector<16x128xf32>
      %c0_44 = arith.constant 0 : index
      %c0_45 = arith.constant 0 : index
      %89 = vector.load %arg7[%c0_44, %c0_45] : memref<16x128xf32, #tpu.memory_space<vmem>>, vector<16x128xf32>
      tpu.vector_store %arg7[%c0_44, %c0_45], %88 {strides = array<i32>} : memref<16x128xf32, #tpu.memory_space<vmem>>, vector<16x128xf32>,
      %cst_46 = arith.constant 0.000000e+00 : f32
      %90 = vector.broadcast %cst_46 : f32 to vector<16x128xf32>
      %c0_47 = arith.constant 0 : index
      %c0_48 = arith.constant 0 : index
      %91 = vector.load %arg8[%c0_47, %c0_48] : memref<16x128xf32, #tpu.memory_space<vmem>>, vector<16x128xf32>
      tpu.vector_store %arg8[%c0_47, %c0_48], %90 {strides = array<i32>} : memref<16x128xf32, #tpu.memory_space<vmem>>, vector<16x128xf32>,
    } else {
    }
    %c256_i32 = arith.constant 256 : i32
    %5 = arith.muli %arg2, %c256_i32 : i32
    %6 = tpu.iota {dimensions = array<i32: 1>} : vector<8x128xi32>
    %c0 = arith.constant 0 : index
    %c0_2 = arith.constant 0 : index
    %7 = vector.load %arg3[%c0, %c0_2] : memref<16x1xi32, #tpu.memory_space<vmem>>, vector<8x1xi32>
    %c1_i32 = arith.constant 1 : i32
    %8 = vector.broadcast %c1_i32 : i32 to vector<8x1xi32>
    %9 = arith.cmpi eq, %7, %8 : vector<8x1xi32>
    %cst = arith.constant 0.000000e+00 : f32
    %10 = vector.broadcast %cst : f32 to vector<8x128xf32>
    %cst_3 = arith.constant 0.000000e+00 : f32
    %11 = vector.broadcast %cst_3 : f32 to vector<8x128xf32>
    %c0_4 = arith.constant 0 : index
    %c0_5 = arith.constant 0 : index
    %12 = vector.load %arg4[%c0_4, %c0_5] : memref<16x256xf32, #tpu.memory_space<vmem>>, vector<8x128xf32>
    %c0_i32_6 = arith.constant 0 : i32
    %13 = arith.addi %5, %c0_i32_6 : i32
    %14 = vector.broadcast %13 : i32 to vector<8x1xi32>
    %15 = arith.subi %7, %14 : vector<8x1xi32>
    %16 = vector.broadcast %15 : vector<8x1xi32> to vector<8x128xi32>
    %17 = arith.cmpi eq, %6, %16 : vector<8x128xi32>
    %cst_7 = arith.constant 0.000000e+00 : f32
    %18 = vector.broadcast %cst_7 : f32 to vector<8x128xf32>
    %19 = arith.select %17, %12, %18 : vector<8x128xi1>, vector<8x128xf32>
    %20 = arith.addf %11, %19 : vector<8x128xf32>
    %21 = arith.addf %10, %12 : vector<8x128xf32>
    %c0_8 = arith.constant 0 : index
    %c128 = arith.constant 128 : index
    %22 = vector.load %arg4[%c0_8, %c128] : memref<16x256xf32, #tpu.memory_space<vmem>>, vector<8x128xf32>
    %c128_i32 = arith.constant 128 : i32
    %23 = arith.addi %5, %c128_i32 : i32
    %24 = vector.broadcast %23 : i32 to vector<8x1xi32>
    %25 = arith.subi %7, %24 : vector<8x1xi32>
    %26 = vector.broadcast %25 : vector<8x1xi32> to vector<8x128xi32>
    %27 = arith.cmpi eq, %6, %26 : vector<8x128xi32>
    %cst_9 = arith.constant 0.000000e+00 : f32
    %28 = vector.broadcast %cst_9 : f32 to vector<8x128xf32>
    %29 = arith.select %27, %22, %28 : vector<8x128xi1>, vector<8x128xf32>
    %30 = arith.addf %20, %29 : vector<8x128xf32>
    %31 = arith.addf %21, %22 : vector<8x128xf32>
    %cst_10 = arith.constant 0.000000e+00 : f32
    %32 = vector.broadcast %cst_10 : f32 to vector<8x128xf32>
    %c0_11 = arith.constant 0 : index
    %c0_12 = arith.constant 0 : index
    %33 = vector.load %arg8[%c0_11, %c0_12] : memref<16x128xf32, #tpu.memory_space<vmem>>, vector<8x128xf32>
    %34 = vector.shape_cast %9 : vector<8x1xi1> to vector<8x1xi1>
    %35 = vector.broadcast %34 : vector<8x1xi1> to vector<8x128xi1>
    %36 = arith.select %35, %32, %31 : vector<8x128xi1>, vector<8x128xf32>
    %37 = arith.addf %33, %36 : vector<8x128xf32>
    %c0_13 = arith.constant 0 : index
    %c0_14 = arith.constant 0 : index
    %38 = vector.load %arg8[%c0_13, %c0_14] : memref<16x128xf32, #tpu.memory_space<vmem>>, vector<8x128xf32>
    tpu.vector_store %arg8[%c0_13, %c0_14], %37 {strides = array<i32>} : memref<16x128xf32, #tpu.memory_space<vmem>>, vector<8x128xf32>,
    %c0_15 = arith.constant 0 : index
    %c0_16 = arith.constant 0 : index
    %39 = vector.load %arg7[%c0_15, %c0_16] : memref<16x128xf32, #tpu.memory_space<vmem>>, vector<8x128xf32>
    %40 = vector.shape_cast %9 : vector<8x1xi1> to vector<8x1xi1>
    %41 = vector.broadcast %40 : vector<8x1xi1> to vector<8x128xi1>
    %42 = arith.select %41, %32, %30 : vector<8x128xi1>, vector<8x128xf32>
    %43 = arith.addf %39, %42 : vector<8x128xf32>
    %c0_17 = arith.constant 0 : index
    %c0_18 = arith.constant 0 : index
    %44 = vector.load %arg7[%c0_17, %c0_18] : memref<16x128xf32, #tpu.memory_space<vmem>>, vector<8x128xf32>
    tpu.vector_store %arg7[%c0_17, %c0_18], %43 {strides = array<i32>} : memref<16x128xf32, #tpu.memory_space<vmem>>, vector<8x128xf32>,
    %c8 = arith.constant 8 : index
    %c0_19 = arith.constant 0 : index
    %45 = vector.load %arg3[%c8, %c0_19] : memref<16x1xi32, #tpu.memory_space<vmem>>, vector<8x1xi32>
    %c1_i32_20 = arith.constant 1 : i32
    %46 = vector.broadcast %c1_i32_20 : i32 to vector<8x1xi32>
    %47 = arith.cmpi eq, %45, %46 : vector<8x1xi32>
    %cst_21 = arith.constant 0.000000e+00 : f32
    %48 = vector.broadcast %cst_21 : f32 to vector<8x128xf32>
    %cst_22 = arith.constant 0.000000e+00 : f32
    %49 = vector.broadcast %cst_22 : f32 to vector<8x128xf32>
    %c8_23 = arith.constant 8 : index
    %c0_24 = arith.constant 0 : index
    %50 = vector.load %arg4[%c8_23, %c0_24] : memref<16x256xf32, #tpu.memory_space<vmem>>, vector<8x128xf32>
    %c0_i32_25 = arith.constant 0 : i32
    %51 = arith.addi %5, %c0_i32_25 : i32
    %52 = vector.broadcast %51 : i32 to vector<8x1xi32>
    %53 = arith.subi %45, %52 : vector<8x1xi32>
    %54 = vector.broadcast %53 : vector<8x1xi32> to vector<8x128xi32>
    %55 = arith.cmpi eq, %6, %54 : vector<8x128xi32>
    %cst_26 = arith.constant 0.000000e+00 : f32
    %56 = vector.broadcast %cst_26 : f32 to vector<8x128xf32>
    %57 = arith.select %55, %50, %56 : vector<8x128xi1>, vector<8x128xf32>
    %58 = arith.addf %49, %57 : vector<8x128xf32>
    %59 = arith.addf %48, %50 : vector<8x128xf32>
    %c8_27 = arith.constant 8 : index
    %c128_28 = arith.constant 128 : index
    %60 = vector.load %arg4[%c8_27, %c128_28] : memref<16x256xf32, #tpu.memory_space<vmem>>, vector<8x128xf32>
    %c128_i32_29 = arith.constant 128 : i32
    %61 = arith.addi %5, %c128_i32_29 : i32
    %62 = vector.broadcast %61 : i32 to vector<8x1xi32>
    %63 = arith.subi %45, %62 : vector<8x1xi32>
    %64 = vector.broadcast %63 : vector<8x1xi32> to vector<8x128xi32>
    %65 = arith.cmpi eq, %6, %64 : vector<8x128xi32>
    %cst_30 = arith.constant 0.000000e+00 : f32
    %66 = vector.broadcast %cst_30 : f32 to vector<8x128xf32>
    %67 = arith.select %65, %60, %66 : vector<8x128xi1>, vector<8x128xf32>
    %68 = arith.addf %58, %67 : vector<8x128xf32>
    %69 = arith.addf %59, %60 : vector<8x128xf32>
    %cst_31 = arith.constant 0.000000e+00 : f32
    %70 = vector.broadcast %cst_31 : f32 to vector<8x128xf32>
    %c8_32 = arith.constant 8 : index
    %c0_33 = arith.constant 0 : index
    %71 = vector.load %arg8[%c8_32, %c0_33] : memref<16x128xf32, #tpu.memory_space<vmem>>, vector<8x128xf32>
    %72 = vector.shape_cast %47 : vector<8x1xi1> to vector<8x1xi1>
    %73 = vector.broadcast %72 : vector<8x1xi1> to vector<8x128xi1>
    %74 = arith.select %73, %70, %69 : vector<8x128xi1>, vector<8x128xf32>
    %75 = arith.addf %71, %74 : vector<8x128xf32>
    %c8_34 = arith.constant 8 : index
    %c0_35 = arith.constant 0 : index
    %76 = vector.load %arg8[%c8_34, %c0_35] : memref<16x128xf32, #tpu.memory_space<vmem>>, vector<8x128xf32>
    tpu.vector_store %arg8[%c8_34, %c0_35], %75 {strides = array<i32>} : memref<16x128xf32, #tpu.memory_space<vmem>>, vector<8x128xf32>,
    %c8_36 = arith.constant 8 : index
    %c0_37 = arith.constant 0 : index
    %77 = vector.load %arg7[%c8_36, %c0_37] : memref<16x128xf32, #tpu.memory_space<vmem>>, vector<8x128xf32>
    %78 = vector.shape_cast %47 : vector<8x1xi1> to vector<8x1xi1>
    %79 = vector.broadcast %78 : vector<8x1xi1> to vector<8x128xi1>
    %80 = arith.select %79, %70, %68 : vector<8x128xi1>, vector<8x128xf32>
    %81 = arith.addf %77, %80 : vector<8x128xf32>
    %c8_38 = arith.constant 8 : index
    %c0_39 = arith.constant 0 : index
    %82 = vector.load %arg7[%c8_38, %c0_39] : memref<16x128xf32, #tpu.memory_space<vmem>>, vector<8x128xf32>
    tpu.vector_store %arg7[%c8_38, %c0_39], %81 {strides = array<i32>} : memref<16x128xf32, #tpu.memory_space<vmem>>, vector<8x128xf32>,
    %c0_i32_40 = arith.constant 0 : i32
    %83 = arith.cmpi eq, %arg1, %c0_i32_40 : i32
    %c0_i32_41 = arith.constant 0 : i32
    %84 = arith.cmpi eq, %arg2, %c0_i32_41 : i32
    %85 = arith.andi %83, %84 : i1
    %86 = arith.extui %85 : i1 to i32
    %c0_i32_42 = arith.constant 0 : i32
    %87 = arith.cmpi ne, %86, %c0_i32_42 : i32
    scf.if %87 {
      %c0_43 = arith.constant 0 : index
      %c0_44 = arith.constant 0 : index
      %88 = vector.load %arg7[%c0_43, %c0_44] : memref<16x128xf32, #tpu.memory_space<vmem>>, vector<16x128xf32>
      %89 = vector.shape_cast %88 : vector<16x128xf32> to vector<1x16x128xf32>
      %cst_45 = arith.constant dense<0.000000e+00> : vector<1xf32>
      %90 = vector.multi_reduction <add>, %89, %cst_45 [1, 2] : vector<1x16x128xf32> to vector<1xf32>
      %91 = vector.shape_cast %90 : vector<1xf32> to vector<1x1x1xf32>
      %92 = vector.extract %91[0, 0, 0] : f32 from vector<1x1x1xf32>
      %cst_46 = arith.constant 0.000000e+00 : f32
      %93 = arith.subf %cst_46, %92 : f32
      %c0_47 = arith.constant 0 : index
      %c0_48 = arith.constant 0 : index
      %94 = vector.load %arg8[%c0_47, %c0_48] : memref<16x128xf32, #tpu.memory_space<vmem>>, vector<16x128xf32>
      %95 = vector.shape_cast %94 : vector<16x128xf32> to vector<1x16x128xf32>
      %cst_49 = arith.constant dense<0.000000e+00> : vector<1xf32>
      %96 = vector.multi_reduction <add>, %95, %cst_49 [1, 2] : vector<1x16x128xf32> to vector<1xf32>
      %97 = vector.shape_cast %96 : vector<1xf32> to vector<1x1x1xf32>
      %98 = vector.extract %97[0, 0, 0] : f32 from vector<1x1x1xf32>
      %cst_50 = arith.constant 0.000000e+00 : f32
      %99 = arith.subf %cst_50, %98 : f32
      %cst_51 = arith.constant 0.899999976 : f32
      %100 = arith.mulf %cst_51, %93 : f32
      %cst_52 = arith.constant 3.906250e-04 : f32
      %101 = arith.mulf %cst_52, %99 : f32
      %102 = arith.addf %100, %101 : f32
      %103 = vector.broadcast %93 : f32 to vector<1x8x128xf32>
      %c0_53 = arith.constant 0 : index
      %c0_54 = arith.constant 0 : index
      %c0_55 = arith.constant 0 : index
      %104 = vector.load %arg6[%c0_53, %c0_54, %c0_55] : memref<1x8x128xf32, #tpu.memory_space<vmem>>, vector<1x8x128xf32>
      tpu.vector_store %arg6[%c0_53, %c0_54, %c0_55], %103 {strides = array<i32>} : memref<1x8x128xf32, #tpu.memory_space<vmem>>, vector<1x8x128xf32>,
      %105 = vector.broadcast %102 : f32 to vector<1x8x128xf32>
      %c0_56 = arith.constant 0 : index
      %c0_57 = arith.constant 0 : index
      %c0_58 = arith.constant 0 : index
      %106 = vector.load %arg5[%c0_56, %c0_57, %c0_58] : memref<1x8x128xf32, #tpu.memory_space<vmem>>, vector<1x8x128xf32>
      tpu.vector_store %arg5[%c0_56, %c0_57, %c0_58], %105 {strides = array<i32>} : memref<1x8x128xf32, #tpu.memory_space<vmem>>, vector<1x8x128xf32>,
    } else {
    }
    return
  }
  func.func @transform_0(%arg0: i32, %arg1: i32, %arg2: i32) -> (i32, i32) {
    %c1_i32 = arith.constant 1 : i32
    %0 = arith.muli %arg0, %c1_i32 : i32
    %1 = arith.addi %0, %arg1 : i32
    %c0_i32 = arith.constant 0 : i32
    %c0_i32_0 = arith.constant 0 : i32
    return %1, %c0_i32 : i32, i32
  }
  func.func @transform_1(%arg0: i32, %arg1: i32, %arg2: i32) -> (i32, i32) {
    %c1_i32 = arith.constant 1 : i32
    %0 = arith.muli %arg0, %c1_i32 : i32
    %1 = arith.addi %0, %arg1 : i32
    %c0_i32 = arith.constant 0 : i32
    return %1, %arg2 : i32, i32
  }
  func.func @transform_2(%arg0: i32, %arg1: i32, %arg2: i32) -> (i32, i32, i32) {
    %c0_i32 = arith.constant 0 : i32
    %c0_i32_0 = arith.constant 0 : i32
    %c0_i32_1 = arith.constant 0 : i32
    return %arg0, %c0_i32, %c0_i32_0 : i32, i32, i32
  }
  func.func @transform_3(%arg0: i32, %arg1: i32, %arg2: i32) -> (i32, i32, i32) {
    %c0_i32 = arith.constant 0 : i32
    %c0_i32_0 = arith.constant 0 : i32
    %c0_i32_1 = arith.constant 0 : i32
    return %arg0, %c0_i32, %c0_i32_0 : i32, i32, i32
  }
}

</mosaic_0001>

<bundles_post_ra>
// kernel: tpu_custom_call.1
= control target key start
LH: loop header
LB: loop body
LE: loop exit
PB: predicated region body
PF: predicated region fallthrough
CT: control target
= control target key end

     0   :  { %9 = vsyncpa [#allocation5], 0  ;;  %s994_s0 = inlined_call_operand.vmem [shape: s32[32,1], index: 0, kind: input, shape index: {}]   ;;  %s995_s1 = inlined_call_operand.hbm [shape: f32[32,256], index: 1, kind: input, shape index: {}]   ;;  %s996_s2 = inlined_call_operand.hbm [shape: f32[2,8,128], index: 2, kind: output, shape index: {0}]   ;;  %s997_s3 = inlined_call_operand.hbm [shape: f32[2,8,128], index: 3, kind: output, shape index: {1}]  }
   0x1   :  { %11 = vsyncpa [#allocation5 + $0x1], 0 }
   0x2   :  { %12 = vsyncpa [#allocation6], 0 }
   0x3   :  { %14 = vsyncpa [#allocation6 + $0x1], 0 }
   0x4   :  { %15 = vsyncpa [#allocation9], 0 }
   0x5   :  { %17 = vsyncpa [#allocation9 + $0x1], 0  ;;  %s803_s12 = smov 0   ;;  %s805_s13 = smov 0  }
   0x6   :  { %s807_s14 = smov 0   ;;  %s809_s15 = smov 0  }
   0x7   :  { %s811_s16 = smov 0   ;;  %s813_s17 = smov 0  }
   0x8 LB: > { %s537_s18 = sadd.s32 4294967295, %s775_s17   ;;  %s538_s19 = sadd.s32 4294967294, %s775_s17   ;;  %s775_s17 = sphi %s813_s17, %s23_s17   ;;  %s771_s16 = sphi %s811_s16, %s1010_s16   ;;  %s767_s15 = sphi %s809_s15, %s1009_s15   ;;  %s763_s14 = sphi %s807_s14, %s1008_s14   ;;  %s759_s13 = sphi %s805_s13, %s1007_s13   ;;  %s755_s12 = sphi %s803_s12, %s1006_s12  }
   0x9   : > { %s42_s20 = sadd.s32 1, %s771_s16  ;;  %s81_s21 = sadd.s32 1, %s763_s14 }
   0xa   : > { %p44_p0 = scmp.ge.s32.totalorder %s42_s20, 2  ;;  %p88_p1 = scmp.ne.s32.totalorder %s763_s14, %s759_s13 }
   0xb   : > { %p89_p2 = scmp.eq.s32.totalorder %s775_s17, 0  ;;  %p94_p3 = scmp.ne.s32.totalorder %s759_s13, %s755_s12 }
   0xc   : > { %s1012_s20 = smov (%p44_p0, %s42_s20), 0  ;;  %p95_p5 = scmp.eq.s32.totalorder %s537_s18, 0 }
   0xd   : > { %p844_p4 = por %p89_p2, %p88_p1  ;;  %s76_s23 = ssub.s32 %s771_s16, %s1012_s20 }
   0xe   : > { %p118_p6 = scmp.eq.s32.totalorder %s537_s18, 1  ;;  %p79_p7 = scmp.eq.s32.totalorder %s76_s23, 0 }
   0xf   : > { %p850_p8 = por %p95_p5, %p94_p3  ;;  %p124_p10 = scmp.eq.s32.totalorder %s538_s19, 1 }
  0x10   : > { %p854_p9 = por %p118_p6, %p88_p1  ;;  %p582_p13 = scmp.lt.s32.totalorder %s775_s17, 2 }
  0x11   : > { %s859_s26 = scalar_select %p79_p7, %s763_s14, %s81_s21  }
  0x12   : > { %p861_p11 = por %p124_p10, %p94_p3  ;;  %s181_s28 = sand.u32 1, %s763_s14  }
  0x13   : > { %s541_s29 = sshll.u32 %s181_s28, 5  ;;  %s560_s30 = sshll.u32 %s771_s16, 9 }
  0x14   : > { %s195_s6 = scalar_lea.hbm %s995_s1, %s560_s30  ;;  %s185_s7 = scalar_lea.vmem [#allocation4], %s541_s29 }
  0x15   : > { %s196_s8 = sshll.u32 %s185_s7, 4  ;;  %p874_p0 = pnand %p582_p13, %p844_p4  ;;  %s197_s8 = int_to_ptr.vmem [resolvable:$true] %s196_s8 }
  0x16   : > { %p545_p1 = scmp.ge.s32.totalorder %s775_s17, 1  ;;  %s182_s10 = scalar_lea.sflag [#allocation5], %s181_s28 }
  0x17   : > { %p639_p2 = pneg %p874_p0  ;;  %s650_s11 = scalar_lea.vmem %s197_s8, 512 }
  0x18   : > { %p651_p3 = scmp.ne.s32.totalorder %s197_s8, %s650_s11  ;;  %s777_s18 = smov [#allocation4]  }
  0x19   : > { %s655_s19 = sshll.u32 %s777_s18, 4  ;;  %s656_s19 = int_to_ptr.vmem [resolvable:$false] %s655_s19 }
  0x1a   : > { %p653_p5 = pnand %p651_p3, %p639_p2  ;;  %s657_s21 = scalar_lea.vmem %s656_s19, 1024 }
  0x1b   : > { %p658_p7 = scmp.lt.s32.totalorder %s197_s8, %s656_s19  ;;  %p659_p10 = scmp.lt.s32.totalorder %s657_s21, %s650_s11 }
  0x1c   : > { %p654_p6 = pneg %p653_p5 }
  0x1d   : > { %p660_p12 = por %p659_p10, %p658_p7 }
  0x1f   : > { %p661_p4 = pnand %p660_p12, %p654_p6 }
  0x21   : > { %664 = shalt.err (!%p661_p4)
}
  0x22   : > { %s778_s22 = smov 256   ;;  %s779_s23 = smov 16  }
  0x23   : > { %574 = dma.hbm_to_vmem [thread:$0]  (!%p874_p0), %s195_s6, 512, %s197_s8, %s182_s10, %s778_s22, %s778_s22, %s779_s23  }
  0x24   : > { %p204_p13 = scmp.lt.s32.totalorder %s775_s17, 3 }
  0x26   : > { %p205_p2 = pnand %p545_p1, %p204_p13 }
  0x27   : > { %s887_s28 = sand.u32 (!%p205_p2), 1, %s759_s13  }
  0x28   : > { %208 = sbr.rel (%p205_p2) target bundleno = 434 (0x1b2), region = 28  ;;  %s546_s29 = sshll.u32 (!%p205_p2), %s887_s28, 5 }
  0x29   : > { %s211_s30 = scalar_lea.sflag (!%p205_p2), [#allocation5], %s887_s28  ;;  %s891_s4 = scalar_lea.vmem (!%p205_p2), [#allocation4], %s546_s29 }
  0x2d   : > { %742 = dma.done.wait (%p850_p8), %s211_s30, 512  }
  0x2e   : > { %744 = vsyncadd (%p850_p8), %s211_s30, 4294966784  ;;  %s549_s5 = sshll.u32 %s767_s15, 1  ;;  %v780_v0 = vmov 0   ;;  %v270_v7 = vlaneseq  ;;  %v310_v11 = vld [vmem:[%s891_s4 + $0x10] sm:$0xff]  ;;  %v274_v12 = vld [vmem:[%s891_s4] sm:$0xff]  ;;  %s547_s24 = sshll.u32 %s887_s28, 3 }
  0x2f   : > { %636 = vset.pattern.permute.xlu1 %v780_v0  ;;  %635 = vset.pattern.permute.xlu0 %v780_v0  ;;  %p250_p12 = scmp.lt.s32.totalorder %s549_s5, 3  ;;  %v319_v13 = vld [vmem:[%s891_s4 + $0x18] sm:$0xff]  ;;  %v284_v14 = vld [vmem:[%s891_s4 + $0x8] sm:$0xff]  ;;  %s998_s10 = sshll.u32 %s767_s15, 7 }
  0x30   : > { %v271_v8 = vand.u32 127, %v270_v7  ;;  %v327_v17 = vadd.f32 %v319_v13, %v310_v11  ;;  %v294_v18 = vadd.f32 %v284_v14, %v274_v12  ;;  %s247_s11 = scalar_lea.vmem [#allocation8], %s547_s24  ;;  %s912_s23 = scalar_lea.hbm %s997_s3, %s998_s10 }
  0x31   : > { %s1014_s5 = smov (!%p250_p12, %s549_s5), 3  ;;  %s408_s18 = sshll.u32 %s247_s11, 4  ;;  %s914_s18 = int_to_ptr.vmem [resolvable:$true] %s408_s18 }
  0x32   : > { %s550_s6 = sshll.u32 %s1014_s5, 3  ;;  %s920_s7 = scalar_lea.vmem [#allocation7], %s547_s24 }
  0x33   : > { %s253_s9 = scalar_lea.vmem %s994_s0, %s550_s6  ;;  %s395_s8 = sshll.u32 %s920_s7, 4  ;;  %s396_s8 = int_to_ptr.vmem [resolvable:$true] %s395_s8 }
  0x34   : > { %v308_v1 = vld [vmem:[%s253_s9 + $0x8] sm:$0xff]  ;;  %v272_v2 = vld [vmem:[%s253_s9] sm:$0xff]  ;;  %s382_s9 = scalar_lea.sflag [#allocation9], %s887_s28  ;;  %s665_s21 = scalar_lea.vmem %s914_s18, 128 }
  0x35   : > { %313 = vperm.xlu1 %636, %v308_v1   ;;  %278 = vperm.xlu0 %635, %v272_v2   ;;  %v552_v3 = vadd.s32 4294967168, %v308_v1  ;;  %v551_v4 = vadd.s32 4294967168, %v272_v2  ;;  %vm309_vm0 = vcmp.eq.s32.totalorder %v308_v1, 1  ;;  %vm273_vm1 = vcmp.eq.s32.totalorder %v272_v2, 1  ;;  %p666_p8 = scmp.ne.s32.totalorder %s914_s18, %s665_s21 }
  0x36   : > { %v329_v5 = vsel %vm309_vm0, 1, %v780_v0  ;;  %v296_v6 = vsel %vm273_vm1, 1, %v780_v0 }
  0x37   : > { %p667_p0 = pnand %p666_p8, %p854_p9 }
  0x39   : > { %322 = vperm.xlu1 %636, %v552_v3   ;;  %289 = vperm.xlu0 %635, %v551_v4   ;;  %p668_p1 = pneg %p667_p0 }
  0x3d   : > { %331 = vperm.xlu1 %636, %v329_v5   ;;  %298 = vperm.xlu0 %635, %v296_v6  }
  0xb0   : > { %v314_v9 = vpop.permute.xlu1 %313  ;;  %v279_v10 = vpop.permute.xlu0 %278 }
  0xb1   : > { %vm315_vm2 = vcmp.eq.s32.totalorder %v271_v8, %v314_v9  ;;  %vm280_vm3 = vcmp.eq.s32.totalorder %v271_v8, %v279_v10 }
  0xb2   : > { %v316_v19 = vsel %vm315_vm2, %v310_v11, 0.0  ;;  %v281_v20 = vsel %vm280_vm3, %v274_v12, 0.0 }
  0xb4   : > { %v323_v15 = vpop.permute.xlu1 %322  ;;  %v290_v16 = vpop.permute.xlu0 %289 }
  0xb5   : > { %vm324_vm4 = vcmp.eq.s32.totalorder %v271_v8, %v323_v15  ;;  %vm291_vm5 = vcmp.eq.s32.totalorder %v271_v8, %v290_v16 }
  0xb6   : > { %v325_v21 = vsel %vm324_vm4, %v319_v13, 0.0  ;;  %v292_v22 = vsel %vm291_vm5, %v284_v14, 0.0 }
  0xb7   : > { %v326_v23 = vadd.f32 %v325_v21, %v316_v19  ;;  %v293_v24 = vadd.f32 %v292_v22, %v281_v20 }
  0xb8   : > { %v332_v25 = vpop.permute.xlu1 %331  ;;  %v299_v26 = vpop.permute.xlu0 %298 }
  0xb9   : > { %vm333_vm6 = vcmp.eq.s32.totalorder %v332_v25, 1  ;;  %vm300_vm7 = vcmp.eq.s32.totalorder %v299_v26, 1 }
  0xba   : > { %v334_v27 = vsel %vm333_vm6, 0.0, %v327_v17  ;;  %v338_v28 = vsel %vm333_vm6, 0.0, %v326_v23  ;;  %v301_v29 = vsel %vm300_vm7, 0.0, %v294_v18  ;;  %v305_v30 = vsel %vm300_vm7, 0.0, %v293_v24 }
  0xbb   : > { %v345_v31 = vadd.f32 %v338_v28, %v305_v30  ;;  %v358_v32 = vadd.f32 %v334_v27, %v301_v29 }
  0xbd   : > { %346 = vadd.xlane.f32.xlu0 %v345_v31  ;;  %359 = vadd.xlane.f32.xlu1 %v358_v32 }
 0x146   : > { %v347_v33 = vpop.xlane.xlu0 %346  ;;  %v360_v34 = vpop.xlane.xlu1 %359 }
 0x147   : > { %v348_v35 = vrot.slane %v347_v33, 4  ;;  %v361_v36 = vrot.slane %v360_v34, 4 }
 0x149   : > { %v349_v37 = vadd.f32 %v348_v35, %v347_v33  ;;  %v362_v38 = vadd.f32 %v361_v36, %v360_v34 }
 0x14b   : > { %v350_v39 = vrot.slane %v349_v37, 2  ;;  %v363_v40 = vrot.slane %v362_v38, 2 }
 0x14d   : > { %v364_v41 = vadd.f32 %v363_v40, %v362_v38  ;;  %v351_v42 = vadd.f32 %v350_v39, %v349_v37 }
 0x14f   : > { %v352_v43 = vrot.slane %v351_v42, 1  ;;  %v365_v44 = vrot.slane %v364_v41, 1 }
 0x151   : > { %v353_v45 = vadd.f32 %v352_v43, %v351_v42  ;;  %v366_v46 = vadd.f32 %v365_v44, %v364_v41 }
 0x153   : > { %561 = vpush %v353_v45 }
 0x154   : > { %563 = vpush %v366_v46 }
 0x184   : > { %s562_s19 = spop %561 }
 0x185   : > { %s355_s29 = ssub.f32 0.0, %s562_s19  ;;  %s564_s30 = spop %563 }
 0x186   : > { %s368_s4 = ssub.f32 0.0, %s564_s30  ;;  %s781_s19 = smov [#allocation8]  }
 0x187   : > { %s916_s5 = smul.f32 0.9, %s355_s29  ;;  %v372_v47 = vstv %s355_s29  ;;  %s669_s22 = sshll.u32 %s781_s19, 4  ;;  %s670_s22 = int_to_ptr.vmem [resolvable:$false] %s669_s22 }
 0x188   : > { %373 = vst [vmem:[%s247_s11] sm:$0xff] %v372_v47  ;;  %s918_s6 = smul.f32 0.000390625, %s368_s4  ;;  %s671_s30 = scalar_lea.vmem %s670_s22, 256 }
 0x189   : > { %p672_p3 = scmp.lt.s32.totalorder %s914_s18, %s670_s22  ;;  %p673_p5 = scmp.lt.s32.totalorder %s671_s30, %s665_s21 }
 0x18b   : > { %p674_p6 = por %p673_p5, %p672_p3 }
 0x18d   : > { %p675_p7 = pnand %p674_p6, %p668_p1 }
 0x18f   : > { %678 = shalt.err (!%p675_p7)
}
 0x190   : > { %s679_s24 = scalar_lea.hbm %s912_s23, 128  ;;  %s683_s4 = scalar_lea.hbm %s997_s3, 256 }
 0x191   : > { %p680_p10 = scmp.ne.s32.totalorder %s912_s23, %s679_s24  ;;  %p684_p2 = scmp.lt.s32.totalorder %s912_s23, %s997_s3 }
 0x192   : > { %p685_p12 = scmp.lt.s32.totalorder %s683_s4, %s679_s24 }
 0x193   : > { %p681_p4 = pnand %p680_p10, %p854_p9 }
 0x194   : > { %p686_p8 = por %p685_p12, %p684_p2 }
 0x195   : > { %p682_p13 = pneg %p681_p4 }
 0x197   : > { %p687_p0 = pnand %p686_p8, %p682_p13 }
 0x199   : > { %690 = shalt.err (!%p687_p0)
}
 0x19a   : > { %568 = dma.vmem_to_hbm [thread:$0]  (%p854_p9), %s914_s18, 128, %s912_s23, %s382_s9  }
 0x19b   : > { %s371_s21 = sadd.f32 %s918_s6, %s916_s5  ;;  %s1004_s22 = sshll.u32 %s767_s15, 7 }
 0x19c   : > { %s951_s24 = scalar_lea.hbm %s996_s2, %s1004_s22  ;;  %s377_s11 = scalar_lea.sflag [#allocation6], %s887_s28 }
 0x19d   : > { %v374_v48 = vstv %s371_s21  ;;  %s691_s29 = scalar_lea.vmem %s396_s8, 128  ;;  %s782_s4 = smov [#allocation7]  }
 0x19e   : > { %375 = vst [vmem:[%s920_s7] sm:$0xff] %v374_v48  ;;  %p692_p1 = scmp.ne.s32.totalorder %s396_s8, %s691_s29  ;;  %s695_s19 = sshll.u32 %s782_s4, 4  ;;  %s696_s19 = int_to_ptr.vmem [resolvable:$false] %s695_s19 }
 0x19f   : > { %s697_s18 = scalar_lea.vmem %s696_s19, 256  ;;  %p698_p6 = scmp.lt.s32.totalorder %s396_s8, %s696_s19 }
 0x1a0   : > { %p693_p3 = pnand %p692_p1, %p854_p9  ;;  %p699_p7 = scmp.lt.s32.totalorder %s697_s18, %s691_s29 }
 0x1a2   : > { %p694_p5 = pneg %p693_p3  ;;  %p700_p10 = por %p699_p7, %p698_p6 }
 0x1a4   : > { %p701_p4 = pnand %p700_p10, %p694_p5 }
 0x1a6   : > { %704 = shalt.err (!%p701_p4)
}
 0x1a7   : > { %s705_s15 = scalar_lea.hbm %s951_s24, 128  ;;  %s709_s5 = scalar_lea.hbm %s996_s2, 256 }
 0x1a8   : > { %p706_p13 = scmp.ne.s32.totalorder %s951_s24, %s705_s15  ;;  %p710_p8 = scmp.lt.s32.totalorder %s951_s24, %s996_s2 }
 0x1a9   : > { %p711_p0 = scmp.lt.s32.totalorder %s709_s5, %s705_s15 }
 0x1aa   : > { %p707_p2 = pnand %p706_p13, %p854_p9 }
 0x1ab   : > { %p712_p1 = por %p711_p0, %p710_p8 }
 0x1ac   : > { %p708_p12 = pneg %p707_p2 }
 0x1ae   : > { %p713_p3 = pnand %p712_p1, %p708_p12 }
 0x1b0   : > { %716 = shalt.err (!%p713_p3)
}
 0x1b1   : > { %567 = dma.vmem_to_hbm [thread:$0]  (%p854_p9), %s396_s8, 128, %s951_s24, %s377_s11  }
 0x1b2 PF: > { %s420_s9 = sand.u32 1, %s755_s12   ;;  %p1005_p5 = scmp.ge.s32.totalorder %s775_s17, 2 }
 0x1b3   : > { %s421_s21 = scalar_lea.sflag [#allocation6], %s420_s9 }
 0x1b4   : > { %p576_p6 = pnand %p1005_p5, %p861_p11 }
 0x1b6   : > { %p577_p7 = pneg %p576_p6 }
 0x1b8   : > { %746 = dma.done.wait (%p577_p7), %s421_s21, 128  }
 0x1b9   : > { %748 = vsyncadd (%p577_p7), %s421_s21, 4294967168  ;;  %s430_s22 = scalar_lea.sflag [#allocation9], %s420_s9 }
 0x1ba   : > { %750 = dma.done.wait (%p577_p7), %s430_s22, 128  }
 0x1bb   : > { %752 = vsyncadd (%p577_p7), %s430_s22, 4294967168  ;;  %s23_s17 = sadd.s32 1, %s775_s17   ;;  %s1006_s12 = smov %s759_s13 }
 0x1bc   : > { %p20_p10 = scmp.ge.s32.totalorder %s23_s17, 4   ;;  %s1007_s13 = smov %s763_s14 }
 0x1bd   : > { %s1008_s14 = smov %s859_s26  ;;  %s1009_s15 = smov %s771_s16 }
 0x1be   : > { %s1010_s16 = smov %s1012_s20  ;;  %22 = sbr.rel (!%p20_p10) target bundleno = 8 (0x8), region = 101 }
 0x1c3   :  { %435 = vsyncpa [#allocation5], 1 }
 0x1c4   :  { %437 = vsyncpa [#allocation5 + $0x1], 1 }
 0x1c5   :  { %438 = vsyncpa [#allocation6], 1 }
 0x1c6   :  { %440 = vsyncpa [#allocation6 + $0x1], 1 }
 0x1c7   :  { %441 = vsyncpa [#allocation9], 1 }
 0x1c8   :  { %443 = vsyncpa [#allocation9 + $0x1], 1 }

</bundles_post_ra>
